<compile_context>
chip_gen: v7x
topology: tpu7x:2x2x1
jax: 0.10.0
libtpu: 0.0.40
codegen_flags: <defaults>
</compile_context>

<pallas_src>
import jax
import jax.numpy as jnp
from jax.experimental import pallas as pl
from jax.experimental.pallas import tpu as pltpu


def _soft_q_kernel(s_ref, a_ref, w1s_ref, w1a_ref, b1_ref,
                   w2_ref, b2_ref, w3_ref, b3_ref, w4_ref, b4_ref, o_ref):
    # All activations are (feature, batch): features on sublanes, batch on
    # lanes.  hidden=32 -> exactly 4 f32 sublane-groups per 128 batch lanes.

    # Layer 1: fused "concat" -- two MXU dots into one f32 accumulator.
    h = jnp.dot(w1s_ref[...], s_ref[...], preferred_element_type=jnp.float32)
    h = h + jnp.dot(w1a_ref[...], a_ref[...], preferred_element_type=jnp.float32)
    h = jnp.maximum(h + b1_ref[...], 0.0)

    # Layers 2 and 3: (32, 32) @ (32, tb) MXU matmuls, full-lane result columns.
    h = jnp.maximum(
        jnp.dot(w2_ref[...], h, preferred_element_type=jnp.float32) + b2_ref[...],
        0.0)
    h = jnp.maximum(
        jnp.dot(w3_ref[...], h, preferred_element_type=jnp.float32) + b3_ref[...],
        0.0)

    # Layer 4 (out_features=1): skip the M=1 MXU matmul.  VPU broadcast-multiply
    # by the (H, 1) weight column, XLU cross-sublane reduce -> lane-dense (1, tb).
    q = jnp.sum(h * w4_ref[...], axis=0, keepdims=True) + b4_ref[...]
    o_ref[...] = q.astype(o_ref.dtype)


def _pick_batch_tile(batch, block_b):
    """Lane-axis (batch) tile. Small B -> one full-extent block; larger B ->
    128-aligned tiles aiming for ~2 grid steps (both TCs on v7x), capped at
    block_b (still tiny in VMEM)."""
    if batch <= 512:
        return batch
    half = -(-batch // 2)                       # cdiv(B, 2)
    half = ((half + 127) // 128) * 128          # round up to full 128 lanes
    return min(block_b, half)


def soft_q_forward(state, action, params, *, block_b=2048):
    """Pallas forward: q = SoftQNetwork(state, action). Returns (B, 1) f32."""
    w1s, w1a, b1, w2, b2, w3, b3, w4_col, b4 = params
    B, num_inputs = state.shape
    num_actions = action.shape[1]

    # Feature-minor -> feature-major so batch lands on the lane axis.
    # (Trace-time transpose of tiny (B, 8)/(B, 4) arrays.)
    s_t = state.T                                # (num_inputs, B)
    a_t = action.T                               # (num_actions, B)

    tb = _pick_batch_tile(B, block_b)
    grid = (pl.cdiv(B, tb),)                     # ragged last block is fine

    def resident(arr):  # same block every step -> stays VMEM-resident
        return pl.BlockSpec(arr.shape, lambda i: (0,) * arr.ndim)

    out_t = pl.pallas_call(
        _soft_q_kernel,
        out_shape=jax.ShapeDtypeStruct((1, B), jnp.float32),
        grid=grid,
        in_specs=[
            pl.BlockSpec((num_inputs, tb), lambda i: (0, i)),
            pl.BlockSpec((num_actions, tb), lambda i: (0, i)),
            resident(w1s), resident(w1a), resident(b1),
            resident(w2), resident(b2),
            resident(w3), resident(b3),
            resident(w4_col), resident(b4),
        ],
        out_specs=pl.BlockSpec((1, tb), lambda i: (0, i)),
        compiler_params=pltpu.CompilerParams(
            dimension_semantics=("parallel",)),
    )(s_t, a_t, w1s, w1a, b1, w2, b2, w3, b3, w4_col, b4)

    return out_t.reshape(B, 1)


def init_soft_q_params(key, num_inputs, num_actions, hidden_size, init_w=0.003):
    """Deterministic init mirroring the PyTorch module's __init__.

    Weights are kept PyTorch-native (out, in); biases are (out, 1) columns so
    they broadcast along the lane (batch) axis inside the kernel.  Layer 1's
    weight is pre-split into its state part (H, num_inputs) and action part
    (H, num_actions); layer 4's weight is stored as the (H, 1) column (== W4^T).
    linear1..3 use the nn.Linear default U(-1/sqrt(fan_in), +1/sqrt(fan_in));
    linear4 uses U(-init_w, +init_w).
    """
    in_dim = num_inputs + num_actions
    keys = jax.random.split(key, 8)

    def u(k, shape, bound):
        return jax.random.uniform(k, shape, jnp.float32,
                                  minval=-bound, maxval=bound)

    bound1 = in_dim ** -0.5
    bound2 = hidden_size ** -0.5
    w1 = u(keys[0], (hidden_size, in_dim), bound1)
    b1 = u(keys[1], (hidden_size, 1), bound1)
    w2 = u(keys[2], (hidden_size, hidden_size), bound2)
    b2 = u(keys[3], (hidden_size, 1), bound2)
    w3 = u(keys[4], (hidden_size, hidden_size), bound2)
    b3 = u(keys[5], (hidden_size, 1), bound2)
    w4_col = u(keys[6], (hidden_size, 1), float(init_w))
    b4 = u(keys[7], (1, 1), float(init_w))
    return (w1[:, :num_inputs], w1[:, num_inputs:], b1,
            w2, b2, w3, b3, w4_col, b4)


def soft_q_forward_ref(state, action, params):
    """Pure-JAX reference (identical math to the PyTorch forward)."""
    w1s, w1a, b1, w2, b2, w3, b3, w4_col, b4 = params
    x = jnp.concatenate([state, action], axis=1)
    w1 = jnp.concatenate([w1s, w1a], axis=1)          # (H, in_dim), PyTorch layout
    h = jax.nn.relu(x @ w1.T + b1.T)
    h = jax.nn.relu(h @ w2.T + b2.T)
    h = jax.nn.relu(h @ w3.T + b3.T)
    return h @ w4_col + b4                            # (B, 1)


if __name__ == "__main__":
    # Small shapes consistent with the module: batch=2, num_inputs=8,
    # num_actions=4, hidden_size=32.
    B, NUM_INPUTS, NUM_ACTIONS, HIDDEN = 2, 8, 4, 32

    key = jax.random.PRNGKey(0)
    k_state, k_action, k_params, k_big = jax.random.split(key, 4)

    params = init_soft_q_params(k_params, NUM_INPUTS, NUM_ACTIONS, HIDDEN)

    # Small-batch path (single full-extent block).
    state = jax.random.normal(k_state, (B, NUM_INPUTS), jnp.float32)
    action = jax.random.normal(k_action, (B, NUM_ACTIONS), jnp.float32)
    q = jax.block_until_ready(soft_q_forward(state, action, params))
    q_ref = soft_q_forward_ref(state, action, params)
    assert q.shape == (B, 1), q.shape
    assert jnp.allclose(q, q_ref, atol=1e-5, rtol=1e-5), (q, q_ref)

    # Batch-tiled path: B not a multiple of 128 -> exercises the ragged last
    # lane-tile (no wrapper-side padding) and the 2-step parallel grid.
    BIG_B = 1000
    ks, ka = jax.random.split(k_big)
    state_b = jax.random.normal(ks, (BIG_B, NUM_INPUTS), jnp.float32)
    action_b = jax.random.normal(ka, (BIG_B, NUM_ACTIONS), jnp.float32)
    q_b = jax.block_until_ready(soft_q_forward(state_b, action_b, params))
    q_b_ref = soft_q_forward_ref(state_b, action_b, params)
    assert q_b.shape == (BIG_B, 1), q_b.shape
    assert jnp.allclose(q_b, q_b_ref, atol=1e-4, rtol=1e-4)

    print("KERNEL_OK")
</pallas_src>

<mosaic_0001>
module attributes {stable_mosaic.version = 11 : i64} {
  func.func @_soft_q_kernel(%arg0: i32, %arg1: memref<8x2xf32, #tpu.memory_space<vmem>>, %arg2: memref<4x2xf32, #tpu.memory_space<vmem>>, %arg3: memref<32x8xf32, #tpu.memory_space<vmem>>, %arg4: memref<32x4xf32, #tpu.memory_space<vmem>>, %arg5: memref<32x1xf32, #tpu.memory_space<vmem>>, %arg6: memref<32x32xf32, #tpu.memory_space<vmem>>, %arg7: memref<32x1xf32, #tpu.memory_space<vmem>>, %arg8: memref<32x32xf32, #tpu.memory_space<vmem>>, %arg9: memref<32x1xf32, #tpu.memory_space<vmem>>, %arg10: memref<32x1xf32, #tpu.memory_space<vmem>>, %arg11: memref<1x1xf32, #tpu.memory_space<vmem>>, %arg12: memref<1x2xf32, #tpu.memory_space<vmem>>) attributes {dimension_semantics = [#tpu.dimension_semantics<parallel>], iteration_bounds = array<i64: 1>, scalar_prefetch = 0 : i64, scratch_operands = 0 : i64, tpu.core_type = #tpu.core_type<tc>, window_params = [{transform_indices = @transform_0, window_bounds = array<i64: 8, 2>}, {transform_indices = @transform_1, window_bounds = array<i64: 4, 2>}, {pipeline_mode = #tpu.pipeline_mode<synchronous>, transform_indices = @transform_2, window_bounds = array<i64: 32, 8>}, {pipeline_mode = #tpu.pipeline_mode<synchronous>, transform_indices = @transform_3, window_bounds = array<i64: 32, 4>}, {pipeline_mode = #tpu.pipeline_mode<synchronous>, transform_indices = @transform_4, window_bounds = array<i64: 32, 1>}, {pipeline_mode = #tpu.pipeline_mode<synchronous>, transform_indices = @transform_5, window_bounds = array<i64: 32, 32>}, {pipeline_mode = #tpu.pipeline_mode<synchronous>, transform_indices = @transform_6, window_bounds = array<i64: 32, 1>}, {pipeline_mode = #tpu.pipeline_mode<synchronous>, transform_indices = @transform_7, window_bounds = array<i64: 32, 32>}, {pipeline_mode = #tpu.pipeline_mode<synchronous>, transform_indices = @transform_8, window_bounds = array<i64: 32, 1>}, {pipeline_mode = #tpu.pipeline_mode<synchronous>, transform_indices = @transform_9, window_bounds = array<i64: 32, 1>}, {pipeline_mode = #tpu.pipeline_mode<synchronous>, transform_indices = @transform_10, window_bounds = array<i64: 1, 1>}, {transform_indices = @transform_11, window_bounds = array<i64: 1, 2>}]} {
    %c0 = arith.constant 0 : index
    %c0_0 = arith.constant 0 : index
    %0 = vector.load %arg3[%c0, %c0_0] : memref<32x8xf32, #tpu.memory_space<vmem>>, vector<32x8xf32>
    %c0_1 = arith.constant 0 : index
    %c0_2 = arith.constant 0 : index
    %1 = vector.load %arg1[%c0_1, %c0_2] : memref<8x2xf32, #tpu.memory_space<vmem>>, vector<8x2xf32>
    %cst = arith.constant dense<0.000000e+00> : vector<32x2xf32>
    %2 = tpu.matmul %0, %1, %cst {dimension_numbers = #tpu.dot_dimension_numbers<[1], [0], [0], [1], [0, 0, 1, 1], [], []>} : vector<32x8xf32>, vector<8x2xf32>, vector<32x2xf32> -> vector<32x2xf32>
    %c0_3 = arith.constant 0 : index
    %c0_4 = arith.constant 0 : index
    %3 = vector.load %arg4[%c0_3, %c0_4] : memref<32x4xf32, #tpu.memory_space<vmem>>, vector<32x4xf32>
    %c0_5 = arith.constant 0 : index
    %c0_6 = arith.constant 0 : index
    %4 = vector.load %arg2[%c0_5, %c0_6] : memref<4x2xf32, #tpu.memory_space<vmem>>, vector<4x2xf32>
    %cst_7 = arith.constant dense<0.000000e+00> : vector<32x2xf32>
    %5 = tpu.matmul %3, %4, %cst_7 {dimension_numbers = #tpu.dot_dimension_numbers<[1], [0], [0], [1], [0, 0, 1, 1], [], []>} : vector<32x4xf32>, vector<4x2xf32>, vector<32x2xf32> -> vector<32x2xf32>
    %6 = arith.addf %2, %5 : vector<32x2xf32>
    %c0_8 = arith.constant 0 : index
    %c0_9 = arith.constant 0 : index
    %7 = vector.load %arg5[%c0_8, %c0_9] : memref<32x1xf32, #tpu.memory_space<vmem>>, vector<32x1xf32>
    %8 = vector.broadcast %7 : vector<32x1xf32> to vector<32x2xf32>
    %9 = arith.addf %6, %8 : vector<32x2xf32>
    %cst_10 = arith.constant 0.000000e+00 : f32
    %10 = vector.broadcast %cst_10 : f32 to vector<32x2xf32>
    %11 = arith.maximumf %9, %10 : vector<32x2xf32>
    %c0_11 = arith.constant 0 : index
    %c0_12 = arith.constant 0 : index
    %12 = vector.load %arg6[%c0_11, %c0_12] : memref<32x32xf32, #tpu.memory_space<vmem>>, vector<32x32xf32>
    %cst_13 = arith.constant dense<0.000000e+00> : vector<32x2xf32>
    %13 = tpu.matmul %12, %11, %cst_13 {dimension_numbers = #tpu.dot_dimension_numbers<[1], [0], [0], [1], [0, 0, 1, 1], [], []>} : vector<32x32xf32>, vector<32x2xf32>, vector<32x2xf32> -> vector<32x2xf32>
    %c0_14 = arith.constant 0 : index
    %c0_15 = arith.constant 0 : index
    %14 = vector.load %arg7[%c0_14, %c0_15] : memref<32x1xf32, #tpu.memory_space<vmem>>, vector<32x1xf32>
    %15 = vector.broadcast %14 : vector<32x1xf32> to vector<32x2xf32>
    %16 = arith.addf %13, %15 : vector<32x2xf32>
    %cst_16 = arith.constant 0.000000e+00 : f32
    %17 = vector.broadcast %cst_16 : f32 to vector<32x2xf32>
    %18 = arith.maximumf %16, %17 : vector<32x2xf32>
    %c0_17 = arith.constant 0 : index
    %c0_18 = arith.constant 0 : index
    %19 = vector.load %arg8[%c0_17, %c0_18] : memref<32x32xf32, #tpu.memory_space<vmem>>, vector<32x32xf32>
    %cst_19 = arith.constant dense<0.000000e+00> : vector<32x2xf32>
    %20 = tpu.matmul %19, %18, %cst_19 {dimension_numbers = #tpu.dot_dimension_numbers<[1], [0], [0], [1], [0, 0, 1, 1], [], []>} : vector<32x32xf32>, vector<32x2xf32>, vector<32x2xf32> -> vector<32x2xf32>
    %c0_20 = arith.constant 0 : index
    %c0_21 = arith.constant 0 : index
    %21 = vector.load %arg9[%c0_20, %c0_21] : memref<32x1xf32, #tpu.memory_space<vmem>>, vector<32x1xf32>
    %22 = vector.broadcast %21 : vector<32x1xf32> to vector<32x2xf32>
    %23 = arith.addf %20, %22 : vector<32x2xf32>
    %cst_22 = arith.constant 0.000000e+00 : f32
    %24 = vector.broadcast %cst_22 : f32 to vector<32x2xf32>
    %25 = arith.maximumf %23, %24 : vector<32x2xf32>
    %c0_23 = arith.constant 0 : index
    %c0_24 = arith.constant 0 : index
    %26 = vector.load %arg10[%c0_23, %c0_24] : memref<32x1xf32, #tpu.memory_space<vmem>>, vector<32x1xf32>
    %27 = vector.broadcast %26 : vector<32x1xf32> to vector<32x2xf32>
    %28 = arith.mulf %25, %27 : vector<32x2xf32>
    %cst_25 = arith.constant dense<0.000000e+00> : vector<2xf32>
    %29 = vector.multi_reduction <add>, %28, %cst_25 [0] : vector<32x2xf32> to vector<2xf32>
    %30 = vector.shape_cast %29 : vector<2xf32> to vector<1x2xf32>
    %c0_26 = arith.constant 0 : index
    %c0_27 = arith.constant 0 : index
    %31 = vector.load %arg11[%c0_26, %c0_27] : memref<1x1xf32, #tpu.memory_space<vmem>>, vector<1x1xf32>
    %32 = vector.broadcast %31 : vector<1x1xf32> to vector<1x2xf32>
    %33 = arith.addf %30, %32 : vector<1x2xf32>
    %c0_28 = arith.constant 0 : index
    %c0_29 = arith.constant 0 : index
    %34 = vector.load %arg12[%c0_28, %c0_29] : memref<1x2xf32, #tpu.memory_space<vmem>>, vector<1x2xf32>
    tpu.vector_store %arg12[%c0_28, %c0_29], %33 {strides = array<i32>} : memref<1x2xf32, #tpu.memory_space<vmem>>, vector<1x2xf32>,
    return
  }
  func.func @transform_0(%arg0: i32) -> (i32, i32) {
    %c0_i32 = arith.constant 0 : i32
    %c0_i32_0 = arith.constant 0 : i32
    return %c0_i32, %arg0 : i32, i32
  }
  func.func @transform_1(%arg0: i32) -> (i32, i32) {
    %c0_i32 = arith.constant 0 : i32
    %c0_i32_0 = arith.constant 0 : i32
    return %c0_i32, %arg0 : i32, i32
  }
  func.func @transform_2(%arg0: i32) -> (i32, i32) {
    %c0_i32 = arith.constant 0 : i32
    %c0_i32_0 = arith.constant 0 : i32
    %c0_i32_1 = arith.constant 0 : i32
    return %c0_i32, %c0_i32_0 : i32, i32
  }
  func.func @transform_3(%arg0: i32) -> (i32, i32) {
    %c0_i32 = arith.constant 0 : i32
    %c0_i32_0 = arith.constant 0 : i32
    %c0_i32_1 = arith.constant 0 : i32
    return %c0_i32, %c0_i32_0 : i32, i32
  }
  func.func @transform_4(%arg0: i32) -> (i32, i32) {
    %c0_i32 = arith.constant 0 : i32
    %c0_i32_0 = arith.constant 0 : i32
    %c0_i32_1 = arith.constant 0 : i32
    return %c0_i32, %c0_i32_0 : i32, i32
  }
  func.func @transform_5(%arg0: i32) -> (i32, i32) {
    %c0_i32 = arith.constant 0 : i32
    %c0_i32_0 = arith.constant 0 : i32
    %c0_i32_1 = arith.constant 0 : i32
    return %c0_i32, %c0_i32_0 : i32, i32
  }
  func.func @transform_6(%arg0: i32) -> (i32, i32) {
    %c0_i32 = arith.constant 0 : i32
    %c0_i32_0 = arith.constant 0 : i32
    %c0_i32_1 = arith.constant 0 : i32
    return %c0_i32, %c0_i32_0 : i32, i32
  }
  func.func @transform_7(%arg0: i32) -> (i32, i32) {
    %c0_i32 = arith.constant 0 : i32
    %c0_i32_0 = arith.constant 0 : i32
    %c0_i32_1 = arith.constant 0 : i32
    return %c0_i32, %c0_i32_0 : i32, i32
  }
  func.func @transform_8(%arg0: i32) -> (i32, i32) {
    %c0_i32 = arith.constant 0 : i32
    %c0_i32_0 = arith.constant 0 : i32
    %c0_i32_1 = arith.constant 0 : i32
    return %c0_i32, %c0_i32_0 : i32, i32
  }
  func.func @transform_9(%arg0: i32) -> (i32, i32) {
    %c0_i32 = arith.constant 0 : i32
    %c0_i32_0 = arith.constant 0 : i32
    %c0_i32_1 = arith.constant 0 : i32
    return %c0_i32, %c0_i32_0 : i32, i32
  }
  func.func @transform_10(%arg0: i32) -> (i32, i32) {
    %c0_i32 = arith.constant 0 : i32
    %c0_i32_0 = arith.constant 0 : i32
    %c0_i32_1 = arith.constant 0 : i32
    return %c0_i32, %c0_i32_0 : i32, i32
  }
  func.func @transform_11(%arg0: i32) -> (i32, i32) {
    %c0_i32 = arith.constant 0 : i32
    %c0_i32_0 = arith.constant 0 : i32
    return %c0_i32, %arg0 : i32, i32
  }
}

</mosaic_0001>

<bundles_post_ra>
// kernel: tpu_custom_call.1
= control target key start
LH: loop header
LB: loop body
LE: loop exit
PB: predicated region body
PF: predicated region fallthrough
CT: control target
= control target key end

     0   :  { %s945_s0 = inlined_call_operand.vmem [shape: f32[8,2], index: 0, kind: input, shape index: {}]   ;;  %s946_s1 = inlined_call_operand.vmem [shape: f32[4,2], index: 1, kind: input, shape index: {}]   ;;  %s947_s2 = inlined_call_operand.vmem [shape: f32[32,8], index: 2, kind: input, shape index: {}]   ;;  %s948_s3 = inlined_call_operand.vmem [shape: f32[32,4], index: 3, kind: input, shape index: {}]   ;;  %s949_s4 = inlined_call_operand.vmem [shape: f32[32,1], index: 4, kind: input, shape index: {}]   ;;  %s950_s5 = inlined_call_operand.vmem [shape: f32[32,32], index: 5, kind: input, shape index: {}]   ;;  %s951_s6 = inlined_call_operand.vmem [shape: f32[32,1], index: 6, kind: input, shape index: {}]   ;;  %s952_s7 = inlined_call_operand.vmem [shape: f32[32,32], index: 7, kind: input, shape index: {}]   ;;  %s953_s8 = inlined_call_operand.vmem [shape: f32[32,1], index: 8, kind: input, shape index: {}]   ;;  %s954_s9 = inlined_call_operand.vmem [shape: f32[32,1], index: 9, kind: input, shape index: {}]   ;;  %s955_s10 = inlined_call_operand.<no memory space> [shape: f32[1,1], index: 10, kind: input, shape index: {}]   ;;  %s956_s11 = inlined_call_operand.hbm [shape: f32[1,2], index: 11, kind: output, shape index: {}]  }
   0x1   :  { %v16_v0 = vstv %s955_s10 }
   0x2   :  { %17 = vst [vmem:[#allocation2] sm:$0x1] %v16_v0 }
   0x3   :  { %v50_v1 = vld [vmem:[%s946_s1] sm:$0xf]  ;;  %vm64_vm0 = vcmask 1043456   ;;  %vm51_vm1 = vcmask 31744   ;;  %v47_v3 = vld [vmem:[%s948_s3 + $0x8] sm:$0xff]  ;;  %v48_v5 = vld [vmem:[%s948_s3 + $0x10] sm:$0xff] }
   0x4   :  { %v46_v2 = vld [vmem:[%s948_s3] sm:$0xff]  ;;  %654 = vmatprep.subr.msk.mxu0 %vm64_vm0, %v50_v1  ;;  %v750_v6 = vmov 0   ;;  %v49_v8 = vld [vmem:[%s948_s3 + $0x18] sm:$0xff]  ;;  %v253_v9 = vld [vmem:[%s949_s4 + $0x10] sm:$0xff]  ;;  %vm153_vm2 = vcmask 64512  }
   0x5   :  { %656 = vmatprep.mubr.msk.f32.mxu0 %vm51_vm1, %v46_v2  ;;  %v45_v4 = vld [vmem:[%s945_s0] sm:$0xff]  ;;  %655 = vmatpush3.msk.msra.mxu0 %vm64_vm0, %v50_v1  ;;  %v252_v11 = vld [vmem:[%s949_s4 + $0x8] sm:$0xff]  ;;  %v254_v12 = vld [vmem:[%s949_s4 + $0x18] sm:$0xff] }
   0x6   :  { %724 = vset.pattern.permute.xlu0 %v750_v6  ;;  %657 = vmatmul.mubr.msk.f32.vlgmr.msra.gmra.mrb[0].mxu0 %vm51_vm1, %v47_v3  ;;  %v251_v7 = vld [vmem:[%s949_s4] sm:$0xff]  ;;  %v42_v13 = vld [vmem:[%s947_s2 + $0x8] sm:$0xff]  ;;  %v43_v14 = vld [vmem:[%s947_s2 + $0x10] sm:$0xff] }
   0x7   :  { %662 = vmatprep.subr.mxu0 %v45_v4  ;;  %659 = vmatprep.mubr.msk.f32.mxu0 %vm51_vm1, %v48_v5  ;;  %v41_v10 = vld [vmem:[%s947_s2] sm:$0xff] }
   0x8   :  { %663 = vmatpush3.msra.mxu0 %v45_v4  ;;  %257 = vperm.xlu0 %724, %v251_v7  }
   0x9   :  { %725 = vset.pattern.permute.xlu1 %v750_v6 }
   0xa   :  { %267 = vperm.xlu1 %725, %v253_v9   ;;  %660 = vmatmul.mubr.msk.f32.gmra.mrb[2].mxu0 %vm51_vm1, %v49_v8 }
   0xb   :  { %664 = vmatprep.mubr.msk.f32.mxu0 %vm153_vm2, %v41_v10 }
   0xc   :  { %262 = vperm.xlu0 %724, %v252_v11  }
   0xd   :  { %18 = vsyncpa [#allocation4], 0  ;;  %v287_v15 = vld [vmem:[%s951_s6] sm:$0xff]  ;;  %v288_v16 = vld [vmem:[%s951_s6 + $0x8] sm:$0xff]  ;;  %vm311_vm3 = vcmask 261120   ;;  %vm570_vm4 = vcmask 15360  }
   0xe   :  { %272 = vperm.xlu1 %725, %v254_v12   ;;  %665 = vmatmul.mubr.msk.f32.vlgmr.msra.gmra.mrb[0].mxu0 %vm153_vm2, %v42_v13  ;;  %v44_v17 = vld [vmem:[%s947_s2 + $0x18] sm:$0xff]  ;;  %v289_v18 = vld [vmem:[%s951_s6 + $0x10] sm:$0xff]  ;;  %v417_v20 = vld [vmem:[%s953_s8] sm:$0xff]  ;;  %vm595_vm5 = vcmask 8192  }
   0xf   :  { %667 = vmatprep.mubr.msk.f32.mxu0 %vm153_vm2, %v43_v14  ;;  %v290_v19 = vld [vmem:[%s951_s6 + $0x18] sm:$0xff]  ;;  %v418_v21 = vld [vmem:[%s953_s8 + $0x8] sm:$0xff]  ;;  %v419_v22 = vld [vmem:[%s953_s8 + $0x10] sm:$0xff] }
  0x10   :  { %293 = vperm.xlu0 %724, %v287_v15   ;;  %v420_v23 = vld [vmem:[%s953_s8 + $0x18] sm:$0xff]  ;;  %v542_v24 = vld [vmem:[%s954_s9] sm:$0xff]  ;;  %v543_v25 = vld [vmem:[%s954_s9 + $0x8] sm:$0xff] }
  0x11   :  { %v544_v26 = vld [vmem:[%s954_s9 + $0x10] sm:$0xff]  ;;  %v545_v27 = vld [vmem:[%s954_s9 + $0x18] sm:$0xff]  ;;  %v584_v28 = vld [vmem:[#allocation2] sm:$0x1] }
  0x12   :  { %298 = vperm.xlu1 %725, %v288_v16   ;;  %668 = vmatmul.mubr.msk.f32.gmra.mrb[2].mxu0 %vm153_vm2, %v44_v17  ;;  %v283_v29 = vld [vmem:[%s950_s5] sm:$0xff]  ;;  %v284_v48 = vld [vmem:[%s950_s5 + $0x8] sm:$0xff]  ;;  %v285_v49 = vld [vmem:[%s950_s5 + $0x10] sm:$0xff] }
  0x13   :  { %678 = vmatprep.mubr.msk.f32.mxu1 %vm311_vm3, %v283_v29  ;;  %v286_v50 = vld [vmem:[%s950_s5 + $0x18] sm:$0xff]  ;;  %v413_v51 = vld [vmem:[%s952_s7] sm:$0xff]  ;;  %v415_v52 = vld [vmem:[%s952_s7 + $0x10] sm:$0xff] }
  0x14   :  { %303 = vperm.xlu0 %724, %v289_v18   ;;  %692 = vmatprep.mubr.msk.f32.mxu0 %vm311_vm3, %v413_v51  ;;  %v414_v7 = vld [vmem:[%s952_s7 + $0x8] sm:$0xff]  ;;  %v416_v8 = vld [vmem:[%s952_s7 + $0x18] sm:$0xff]  ;;  %s751_s7 = smov [#allocation3]  }
  0x15   :  { %s603_s2 = sshll.u32 %s751_s7, 4  ;;  %s604_s2 = int_to_ptr.vmem [resolvable:$true] %s603_s2 }
  0x16   :  { %308 = vperm.xlu1 %725, %v290_v19   ;;  %s726_s12 = scalar_lea.vmem %s604_s2, 16  ;;  %s730_s13 = scalar_lea.vmem %s604_s2, 32 }
  0x17   :  { %p727_p0 = scmp.ne.s32.totalorder %s604_s2, %s726_s12  ;;  %p731_p1 = scmp.lt.s32.totalorder %s604_s2, %s604_s2 }
  0x18   :  { %423 = vperm.xlu0 %724, %v417_v20   ;;  %p732_p2 = scmp.lt.s32.totalorder %s730_s13, %s726_s12 }
  0x1a   :  { %428 = vperm.xlu1 %725, %v418_v21   ;;  %p733_p3 = por %p732_p2, %p731_p1 }
  0x1c   :  { %433 = vperm.xlu0 %724, %v419_v22   ;;  %p734_p4 = pnand %p733_p3, %p727_p0 }
  0x1e   :  { %438 = vperm.xlu1 %725, %v420_v23  }
  0x20   :  { %548 = vperm.xlu0 %724, %v542_v24  }
  0x22   :  { %553 = vperm.xlu1 %725, %v543_v25  }
  0x24   :  { %558 = vperm.xlu0 %724, %v544_v26  }
  0x26   :  { %563 = vperm.xlu1 %725, %v545_v27  }
  0x28   :  { %587 = vperm.xlu0 %724, %v584_v28  }
  0x87   :  { %v258_v30 = vpop.permute.xlu0 %257 }
  0x89   :  { %v268_v31 = vpop.permute.xlu1 %267 }
  0x8b   :  { %v263_v32 = vpop.permute.xlu0 %262 }
  0x8d   :  { %v273_v38 = vpop.permute.xlu1 %272 }
  0x8f   :  { %v294_v54 = vpop.permute.xlu0 %293 }
  0x91   :  { %v299_v53 = vpop.permute.xlu1 %298 }
  0x93   :  { %v304_v63 = vpop.permute.xlu0 %303 }
  0x95   :  { %v309_v60 = vpop.permute.xlu1 %308 }
  0x97   :  { %v424_v9 = vpop.permute.xlu0 %423 }
  0x99   :  { %v429_v10 = vpop.permute.xlu1 %428 }
  0x9b   :  { %v434_v11 = vpop.permute.xlu0 %433 }
  0x9d   :  { %v439_v12 = vpop.permute.xlu1 %438 }
  0x9f   :  { %v549_v13 = vpop.permute.xlu0 %548 }
  0xa1   :  { %v554_v14 = vpop.permute.xlu1 %553 }
  0xa3   :  { %v559_v27 = vpop.permute.xlu0 %558 }
  0xe1   :  { %v666_v33 = vpop.f32.mrb[0].mxu0 }
  0xe2   :  { %v276_v34 = vadd.f32 %v666_v33, %v263_v32  ;;  %v232_v35 = vpop.f32.mrb[1].mxu0 }
  0xe3   :  { %v275_v36 = vadd.f32 %v258_v30, %v232_v35 }
  0xe4   :  { %v280_v37 = vmax.f32 %v276_v34, 0.0 }
  0xe5   :  { %v279_v39 = vmax.f32 %v275_v36, 0.0  ;;  %v669_v40 = vpop.f32.mrb[2].mxu0 }
  0xe6   :  { %v278_v41 = vadd.f32 %v669_v40, %v273_v38  ;;  %v242_v42 = vpop.f32.mrb[3].mxu0 }
  0xe7   :  { %v277_v43 = vadd.f32 %v268_v31, %v242_v42  ;;  %v698_v44 = vpack.c.bf16 %v280_v37, %v279_v39  ;;  %v564_v31 = vpop.permute.xlu1 %563  ;;  %v590_v39 = vlaneseq }
  0xe8   :  { %v282_v45 = vmax.f32 %v278_v41, 0.0 }
  0xe9   :  { %v281_v46 = vmax.f32 %v277_v43, 0.0  ;;  %699 = vmatprep.subr.bf16.mxu1 %v698_v44  ;;  %v591_v42 = vshrl.u32 %v590_v39, 7 }
  0xea   :  { %701 = vmatpush3.bf16.msra.mxu1 %v698_v44 }
  0xeb   :  { %v702_v47 = vpack.c.bf16 %v282_v45, %v281_v46  ;;  %v592_v45 = vsub.s32 0, %v591_v42 }
  0xed   :  { %703 = vmatprep.subr.bf16.mxu1 %v702_v47 }
  0xee   :  { %705 = vmatpush3.bf16.msra.mxu1 %v702_v47  ;;  %v588_v47 = vpop.permute.xlu0 %587 }
  0xf1   :  { %679 = vmatmul.mubr.msk.f32.vlgmr.msra.gmra.mrb[0].mxu1 %vm311_vm3, %v284_v48 }
  0xf2   :  { %681 = vmatprep.mubr.msk.f32.mxu1 %vm311_vm3, %v285_v49  ;;  %v593_v49 = vrot.slane %v588_v47, %v592_v45 }
  0xf5   :  { %682 = vmatmul.mubr.msk.f32.gmra.mrb[2].mxu1 %vm311_vm3, %v286_v50 }
  0xf6   :  { %695 = vmatprep.mubr.msk.f32.mxu1 %vm311_vm3, %v415_v52 }
 0x1c4   :  { %v680_v55 = vpop.f32.mrb[0].mxu1 }
 0x1c5   :  { %v396_v56 = vadd.f32 %v680_v55, %v299_v53  ;;  %v390_v57 = vpop.f32.mrb[1].mxu1 }
 0x1c6   :  { %v391_v58 = vadd.f32 %v390_v57, %v294_v54 }
 0x1c7   :  { %v410_v59 = vmax.f32 %v396_v56, 0.0 }
 0x1c8   :  { %v409_v61 = vmax.f32 %v391_v58, 0.0  ;;  %v683_v62 = vpop.f32.mrb[2].mxu1 }
 0x1c9   :  { %v406_v0 = vadd.f32 %v683_v62, %v309_v60  ;;  %v400_v1 = vpop.f32.mrb[3].mxu1 }
 0x1ca   :  { %v706_v2 = vpack.c.bf16 %v410_v59, %v409_v61  ;;  %v401_v3 = vadd.f32 %v400_v1, %v304_v63 }
 0x1cb   :  { %v412_v4 = vmax.f32 %v406_v0, 0.0 }
 0x1cc   :  { %v411_v5 = vmax.f32 %v401_v3, 0.0  ;;  %707 = vmatprep.subr.bf16.mxu0 %v706_v2  ;;  %714 = vmatprep.subr.bf16.mxu1 %v706_v2 }
 0x1cd   :  { %709 = vmatpush3.bf16.msra.mxu0 %v706_v2  ;;  %716 = vmatpush3.bf16.msra.mxu1 %v706_v2 }
 0x1ce   :  { %v710_v6 = vpack.c.bf16 %v412_v4, %v411_v5 }
 0x1d0   :  { %711 = vmatprep.subr.bf16.mxu0 %v710_v6  ;;  %715 = vmatprep.subr.bf16.mxu1 %v710_v6 }
 0x1d1   :  { %713 = vmatpush3.bf16.msra.mxu0 %v710_v6  ;;  %717 = vmatpush3.bf16.msra.mxu1 %v710_v6 }
 0x1d4   :  { %693 = vmatmul.mubr.msk.f32.vlgmr.msra.gmra.mrb[4].mxu0 %vm311_vm3, %v414_v7  ;;  %696 = vmatmul.mubr.msk.f32.vlgmr.msra.gmra.mrb[4].mxu1 %vm311_vm3, %v416_v8 }
 0x2a7   :  { %v694_v15 = vpop.f32.mrb[4].mxu0  ;;  %v697_v16 = vpop.f32.mrb[4].mxu1 }
 0x2a8   :  { %v525_v17 = vadd.f32 %v694_v15, %v429_v10  ;;  %v535_v18 = vadd.f32 %v697_v16, %v439_v12  ;;  %v519_v19 = vpop.f32.mrb[5].mxu0  ;;  %v529_v20 = vpop.f32.mrb[5].mxu1 }
 0x2a9   :  { %v520_v21 = vadd.f32 %v519_v19, %v424_v9  ;;  %v530_v22 = vadd.f32 %v529_v20, %v434_v11 }
 0x2aa   :  { %v539_v23 = vmax.f32 %v525_v17, 0.0  ;;  %v541_v24 = vmax.f32 %v535_v18, 0.0 }
 0x2ab   :  { %v538_v25 = vmax.f32 %v520_v21, 0.0  ;;  %v540_v26 = vmax.f32 %v530_v22, 0.0 }
 0x2ac   :  { %v567_v28 = vmul.f32 %v554_v14, %v539_v23  ;;  %v569_v33 = vmul.f32 %v564_v31, %v541_v24 }
 0x2ad   :  { %v566_v29 = vmul.f32 %v549_v13, %v538_v25  ;;  %v568_v30 = vmul.f32 %v559_v27, %v540_v26 }
 0x2ae   :  { %v572_v32 = vsel %vm570_vm4, %v567_v28, 0.0  ;;  %v576_v38 = vsel %vm570_vm4, %v569_v33, 0.0 }
 0x2af   :  { %v571_v34 = vsel %vm570_vm4, %v566_v29, 0.0  ;;  %v574_v36 = vsel %vm570_vm4, %v568_v30, 0.0 }
 0x2b0   :  { %v573_v35 = vadd.f32 %v572_v32, %v571_v34 }
 0x2b2   :  { %v575_v37 = vadd.f32 %v574_v36, %v573_v35 }
 0x2b4   :  { %v577_v40 = vadd.f32 %v576_v38, %v575_v37 }
 0x2b6   :  { %v578_v41 = vrot.slane %v577_v40, 4 }
 0x2b8   :  { %v579_v43 = vadd.f32 %v578_v41, %v577_v40 }
 0x2ba   :  { %v580_v44 = vrot.slane %v579_v43, 2 }
 0x2bc   :  { %v581_v46 = vadd.f32 %v580_v44, %v579_v43 }
 0x2be   :  { %v582_v48 = vrot.slane %v581_v46, 1 }
 0x2c0   :  { %v583_v50 = vadd.f32 %v582_v48, %v581_v46 }
 0x2c2   :  { %v594_v51 = vadd.f32 %v593_v49, %v583_v50 }
 0x2c4   :  { %596 = vst.msk [vmem:[#allocation3] sm:$0x1] %vm595_vm5, %v594_v51 }
 0x2c5   :  { %737 = shalt.err (!%p734_p4)
}
 0x2c6   :  { %s738_s6 = scalar_lea.hbm %s956_s11, 16 }
 0x2c7   :  { %p739_p5 = scmp.ne.s32.totalorder %s956_s11, %s738_s6  ;;  %p742_p6 = scmp.lt.u32.totalorder %s738_s6, %s956_s11 }
 0x2c9   :  { %p744_p7 = pnand %p742_p6, %p739_p5 }
 0x2cb   :  { %747 = shalt.err (!%p744_p7)
}
 0x2cc   :  { %606 = dma.vmem_to_hbm [thread:$0]  %s604_s2, 16, %s956_s11, [#allocation4]  }
 0x2cd   :  { %748 = dma.done.wait [#allocation4], 16  }
 0x2ce   :  { %749 = vsyncadd [#allocation4], 4294967280 }
 0x2cf   :  { %610 = vsyncpa [#allocation4], 1 }

</bundles_post_ra>
